<compile_context>
chip_gen: v7x
topology: tpu7x:2x2x1
jax: 0.10.0
libtpu: 0.0.40
codegen_flags: <defaults>
</compile_context>

<pallas_src>
import functools

import jax
import jax.numpy as jnp
from jax.experimental import pallas as pl
from jax.experimental.pallas import tpu as pltpu

LANE = 128
SUBLANE = 8


def _round_up(n, m):
    return ((n + m - 1) // m) * m


def dqn_kernel(x_ref, w1_ref, b1_ref, w2_ref, b2_ref, w3_ref, b3_ref, o_ref):
    """fc1 -> ReLU -> fc2 -> ReLU -> fc3 on one (TB, S) batch tile."""
    cdt = w1_ref.dtype  # MXU input dtype (bf16)

    # x arrives unpadded f32; cast to bf16 here (VPU cast, hidden under MXU/DMA).
    x = x_ref[...].astype(cdt)

    h1 = jnp.dot(x, w1_ref[...], preferred_element_type=jnp.float32)
    h1 = jnp.maximum(h1 + b1_ref[...], 0.0)

    h2 = jnp.dot(h1.astype(cdt), w2_ref[...], preferred_element_type=jnp.float32)
    h2 = jnp.maximum(h2 + b2_ref[...], 0.0)

    out = jnp.dot(h2.astype(cdt), w3_ref[...], preferred_element_type=jnp.float32)
    # Lane-dense 128-wide unmasked store; cast to (bf16) output dtype so the
    # dominant HBM writeback stream is half width.
    o_ref[...] = (out + b3_ref[...]).astype(o_ref.dtype)


def prepare_params(params, *, compute_dtype=jnp.bfloat16):
    """One-time parameter prep (hoisted out of the per-step hot path).

    Casts weights to the MXU compute dtype, keeps biases in f32, and zero-pads
    only the final layer's action dimension to 128 lanes (zero-padded columns
    contribute nothing to the real outputs).
    """
    w1, b1, w2, b2, w3, b3 = params
    A = w3.shape[1]
    A_pad = _round_up(A, LANE)

    w1c = w1.astype(compute_dtype)
    w2c = w2.astype(compute_dtype)
    w3p = jnp.zeros((w3.shape[0], A_pad), compute_dtype).at[:, :A].set(
        w3.astype(compute_dtype))
    b1f = b1.reshape(1, -1).astype(jnp.float32)
    b2f = b2.reshape(1, -1).astype(jnp.float32)
    b3p = jnp.zeros((1, A_pad), jnp.float32).at[:, :A].set(
        b3.reshape(1, -1).astype(jnp.float32))
    return (w1c, b1f, w2c, b2f, w3p, b3p)


def _pick_batch_tile(B, batch_tile):
    """Choose the batch tile TB, padded batch B_pad, and grid size."""
    B8 = _round_up(max(B, 1), SUBLANE)
    TB = min(_round_up(batch_tile, SUBLANE), B8)
    B_pad = _round_up(B, TB)
    grid_b = B_pad // TB
    # v7x has 2 TensorCores sharing the "parallel" axis: keep >= 2 grid steps
    # when splitting still leaves TB >= 256 (which also fills the 256-wide MXU
    # on v6e/v7x). Below 512 rows, prioritize the larger tile.
    if grid_b == 1 and TB >= 512:
        TB = _round_up((TB + 1) // 2, SUBLANE)
        B_pad = _round_up(B, TB)
        grid_b = B_pad // TB
    return TB, B_pad, grid_b


def dqn_forward(x, prepped_params, action_size, *, batch_tile=512,
                out_dtype=jnp.bfloat16, slice_output=True):
    """Forward pass.

    x: [B, state_size] f32 (unpadded, uncast). `prepped_params` comes from
    prepare_params(). Returns [B, action_size] in `out_dtype` (bf16 default).
    With slice_output=False the raw lane-dense (B_pad, 128) buffer is returned;
    callers doing that must ignore the padded batch rows / action columns.
    """
    w1, b1, w2, b2, w3p, b3p = prepped_params
    B, S = x.shape
    H1 = w1.shape[1]      # 256
    H2 = w2.shape[1]      # 128
    A_pad = w3p.shape[1]  # action_size padded to 128
    A = action_size

    TB, B_pad, grid_b = _pick_batch_tile(B, batch_tile)

    # Cheap batch-only pad (no lane padding, no dtype cast) when needed.
    if B_pad != B:
        x = jnp.pad(x, ((0, B_pad - B), (0, 0)))

    w_itemsize = jnp.dtype(w1.dtype).itemsize
    flops = 2 * B_pad * (S * H1 + H1 * H2 + H2 * A_pad)
    bytes_accessed = (
        B_pad * S * x.dtype.itemsize
        + (w1.size + w2.size + w3p.size) * w_itemsize
        + (b1.size + b2.size + b3p.size) * 4
        + B_pad * A_pad * jnp.dtype(out_dtype).itemsize
    )

    resident = lambda i: (0, 0)   # weights/biases: fetched once, VMEM-resident

    out = pl.pallas_call(
        dqn_kernel,
        out_shape=jax.ShapeDtypeStruct((B_pad, A_pad), out_dtype),
        grid=(grid_b,),
        in_specs=[
            pl.BlockSpec((TB, S), lambda i: (i, 0)),   # x: tiled over batch
            pl.BlockSpec((S, H1), resident),
            pl.BlockSpec((1, H1), resident),
            pl.BlockSpec((H1, H2), resident),
            pl.BlockSpec((1, H2), resident),
            pl.BlockSpec((H2, A_pad), resident),
            pl.BlockSpec((1, A_pad), resident),
        ],
        out_specs=pl.BlockSpec((TB, A_pad), lambda i: (i, 0)),
        compiler_params=pltpu.CompilerParams(
            dimension_semantics=("parallel",),
            vmem_limit_bytes=(32 << 20) if TB > 1024 else (16 << 20),
        ),
        cost_estimate=pl.CostEstimate(
            flops=flops, transcendentals=0, bytes_accessed=bytes_accessed
        ),
    )(x, w1, b1, w2, b2, w3p, b3p)

    if slice_output:
        return out[:B, :A]
    return out


def init_params(key, state_size, action_size):
    """Deterministic init mimicking nn.Linear's uniform(-1/sqrt(fan_in), ...)."""
    dims = [(state_size, 256), (256, 128), (128, action_size)]
    params = []
    keys = jax.random.split(key, 2 * len(dims))
    for i, (fan_in, fan_out) in enumerate(dims):
        bound = 1.0 / jnp.sqrt(fan_in)
        w = jax.random.uniform(keys[2 * i], (fan_in, fan_out),
                               minval=-bound, maxval=bound, dtype=jnp.float32)
        b = jax.random.uniform(keys[2 * i + 1], (1, fan_out),
                               minval=-bound, maxval=bound, dtype=jnp.float32)
        params += [w, b]
    return tuple(params)


def dqn_reference_f32(x, params):
    w1, b1, w2, b2, w3, b3 = params
    h1 = jnp.maximum(x @ w1 + b1, 0.0)
    h2 = jnp.maximum(h1 @ w2 + b2, 0.0)
    return h2 @ w3 + b3


def dqn_reference_mixed(x, params, compute_dtype=jnp.bfloat16):
    """Same bf16-inputs / f32-accumulate recipe as the kernel (output in f32)."""
    w1, b1, w2, b2, w3, b3 = params
    dot = functools.partial(jnp.dot, preferred_element_type=jnp.float32)
    h1 = jnp.maximum(dot(x.astype(compute_dtype), w1.astype(compute_dtype)) + b1, 0.0)
    h2 = jnp.maximum(dot(h1.astype(compute_dtype), w2.astype(compute_dtype)) + b2, 0.0)
    return dot(h2.astype(compute_dtype), w3.astype(compute_dtype)) + b3


if __name__ == "__main__":
    key = jax.random.PRNGKey(0)
    kx, kp, kx2 = jax.random.split(key, 3)

    state_size = 16
    action_size = 4

    params = init_params(kp, state_size, action_size)
    prepped = prepare_params(params)   # one-time cast/pad, out of the hot path

    # Small test (batch=2): single grid step with batch-remainder padding.
    x = jax.random.normal(kx, (2, state_size), dtype=jnp.float32)
    out = jax.block_until_ready(dqn_forward(x, prepped, action_size))
    assert out.shape == (2, action_size)
    out32 = out.astype(jnp.float32)

    ref_mixed = dqn_reference_mixed(x, params)
    assert jnp.allclose(out32, ref_mixed, atol=1e-2, rtol=1e-2), \
        "mismatch vs mixed-precision reference"
    ref_f32 = dqn_reference_f32(x, params)
    assert jnp.allclose(out32, ref_f32, atol=6e-2, rtol=6e-2), \
        "mismatch vs f32 reference"

    # Multi-tile test: force several grid steps (exercises the batch pipeline
    # and the padded last tile) with a tiny tile override.
    x2 = jax.random.normal(kx2, (20, state_size), dtype=jnp.float32)
    out2 = jax.block_until_ready(dqn_forward(x2, prepped, action_size, batch_tile=8))
    assert out2.shape == (20, action_size)
    assert jnp.allclose(out2.astype(jnp.float32), dqn_reference_mixed(x2, params),
                        atol=1e-2, rtol=1e-2), "mismatch on multi-tile grid"

    print("KERNEL_OK")
</pallas_src>

<mosaic_0001>
module attributes {stable_mosaic.version = 11 : i64} {
  func.func @dqn_kernel(%arg0: i32, %arg1: memref<8x16xf32, #tpu.memory_space<vmem>>, %arg2: memref<16x256xbf16, #tpu.memory_space<vmem>>, %arg3: memref<1x256xf32, #tpu.memory_space<vmem>>, %arg4: memref<256x128xbf16, #tpu.memory_space<vmem>>, %arg5: memref<1x128xf32, #tpu.memory_space<vmem>>, %arg6: memref<128x128xbf16, #tpu.memory_space<vmem>>, %arg7: memref<1x128xf32, #tpu.memory_space<vmem>>, %arg8: memref<8x128xbf16, #tpu.memory_space<vmem>>) attributes {dimension_semantics = [#tpu.dimension_semantics<parallel>], iteration_bounds = array<i64: 1>, scalar_prefetch = 0 : i64, scratch_operands = 0 : i64, tpu.core_type = #tpu.core_type<tc>, window_params = [{transform_indices = @transform_0, window_bounds = array<i64: 8, 16>}, {pipeline_mode = #tpu.pipeline_mode<synchronous>, transform_indices = @transform_1, window_bounds = array<i64: 16, 256>}, {pipeline_mode = #tpu.pipeline_mode<synchronous>, transform_indices = @transform_2, window_bounds = array<i64: 1, 256>}, {pipeline_mode = #tpu.pipeline_mode<synchronous>, transform_indices = @transform_3, window_bounds = array<i64: 256, 128>}, {pipeline_mode = #tpu.pipeline_mode<synchronous>, transform_indices = @transform_4, window_bounds = array<i64: 1, 128>}, {pipeline_mode = #tpu.pipeline_mode<synchronous>, transform_indices = @transform_5, window_bounds = array<i64: 128, 128>}, {pipeline_mode = #tpu.pipeline_mode<synchronous>, transform_indices = @transform_6, window_bounds = array<i64: 1, 128>}, {transform_indices = @transform_7, window_bounds = array<i64: 8, 128>}]} {
    %c0 = arith.constant 0 : index
    %c0_0 = arith.constant 0 : index
    %0 = vector.load %arg1[%c0, %c0_0] : memref<8x16xf32, #tpu.memory_space<vmem>>, vector<8x16xf32>
    %1 = arith.truncf %0 : vector<8x16xf32> to vector<8x16xbf16>
    %c0_1 = arith.constant 0 : index
    %c0_2 = arith.constant 0 : index
    %2 = vector.load %arg2[%c0_1, %c0_2] : memref<16x256xbf16, #tpu.memory_space<vmem>>, vector<16x256xbf16>
    %cst = arith.constant dense<0.000000e+00> : vector<8x256xf32>
    %3 = tpu.matmul %1, %2, %cst {dimension_numbers = #tpu.dot_dimension_numbers<[1], [0], [0], [1], [0, 0, 1, 1], [], []>} : vector<8x16xbf16>, vector<16x256xbf16>, vector<8x256xf32> -> vector<8x256xf32>
    %c0_3 = arith.constant 0 : index
    %c0_4 = arith.constant 0 : index
    %4 = vector.load %arg3[%c0_3, %c0_4] : memref<1x256xf32, #tpu.memory_space<vmem>>, vector<1x256xf32>
    %5 = vector.broadcast %4 : vector<1x256xf32> to vector<8x256xf32>
    %6 = arith.addf %3, %5 : vector<8x256xf32>
    %cst_5 = arith.constant 0.000000e+00 : f32
    %7 = vector.broadcast %cst_5 : f32 to vector<8x256xf32>
    %8 = arith.maximumf %6, %7 : vector<8x256xf32>
    %9 = arith.truncf %8 : vector<8x256xf32> to vector<8x256xbf16>
    %c0_6 = arith.constant 0 : index
    %c0_7 = arith.constant 0 : index
    %10 = vector.load %arg4[%c0_6, %c0_7] : memref<256x128xbf16, #tpu.memory_space<vmem>>, vector<256x128xbf16>
    %cst_8 = arith.constant dense<0.000000e+00> : vector<8x128xf32>
    %11 = tpu.matmul %9, %10, %cst_8 {dimension_numbers = #tpu.dot_dimension_numbers<[1], [0], [0], [1], [0, 0, 1, 1], [], []>} : vector<8x256xbf16>, vector<256x128xbf16>, vector<8x128xf32> -> vector<8x128xf32>
    %c0_9 = arith.constant 0 : index
    %c0_10 = arith.constant 0 : index
    %12 = vector.load %arg5[%c0_9, %c0_10] : memref<1x128xf32, #tpu.memory_space<vmem>>, vector<1x128xf32>
    %13 = vector.broadcast %12 : vector<1x128xf32> to vector<8x128xf32>
    %14 = arith.addf %11, %13 : vector<8x128xf32>
    %cst_11 = arith.constant 0.000000e+00 : f32
    %15 = vector.broadcast %cst_11 : f32 to vector<8x128xf32>
    %16 = arith.maximumf %14, %15 : vector<8x128xf32>
    %17 = arith.truncf %16 : vector<8x128xf32> to vector<8x128xbf16>
    %c0_12 = arith.constant 0 : index
    %c0_13 = arith.constant 0 : index
    %18 = vector.load %arg6[%c0_12, %c0_13] : memref<128x128xbf16, #tpu.memory_space<vmem>>, vector<128x128xbf16>
    %cst_14 = arith.constant dense<0.000000e+00> : vector<8x128xf32>
    %19 = tpu.matmul %17, %18, %cst_14 {dimension_numbers = #tpu.dot_dimension_numbers<[1], [0], [0], [1], [0, 0, 1, 1], [], []>} : vector<8x128xbf16>, vector<128x128xbf16>, vector<8x128xf32> -> vector<8x128xf32>
    %c0_15 = arith.constant 0 : index
    %c0_16 = arith.constant 0 : index
    %20 = vector.load %arg7[%c0_15, %c0_16] : memref<1x128xf32, #tpu.memory_space<vmem>>, vector<1x128xf32>
    %21 = vector.broadcast %20 : vector<1x128xf32> to vector<8x128xf32>
    %22 = arith.addf %19, %21 : vector<8x128xf32>
    %23 = arith.truncf %22 : vector<8x128xf32> to vector<8x128xbf16>
    %c0_17 = arith.constant 0 : index
    %c0_18 = arith.constant 0 : index
    %24 = vector.load %arg8[%c0_17, %c0_18] : memref<8x128xbf16, #tpu.memory_space<vmem>>, vector<8x128xbf16>
    tpu.vector_store %arg8[%c0_17, %c0_18], %23 {strides = array<i32>} : memref<8x128xbf16, #tpu.memory_space<vmem>>, vector<8x128xbf16>,
    return
  }
  func.func @transform_0(%arg0: i32) -> (i32, i32) {
    %c0_i32 = arith.constant 0 : i32
    %c0_i32_0 = arith.constant 0 : i32
    return %arg0, %c0_i32 : i32, i32
  }
  func.func @transform_1(%arg0: i32) -> (i32, i32) {
    %c0_i32 = arith.constant 0 : i32
    %c0_i32_0 = arith.constant 0 : i32
    %c0_i32_1 = arith.constant 0 : i32
    return %c0_i32, %c0_i32_0 : i32, i32
  }
  func.func @transform_2(%arg0: i32) -> (i32, i32) {
    %c0_i32 = arith.constant 0 : i32
    %c0_i32_0 = arith.constant 0 : i32
    %c0_i32_1 = arith.constant 0 : i32
    return %c0_i32, %c0_i32_0 : i32, i32
  }
  func.func @transform_3(%arg0: i32) -> (i32, i32) {
    %c0_i32 = arith.constant 0 : i32
    %c0_i32_0 = arith.constant 0 : i32
    %c0_i32_1 = arith.constant 0 : i32
    return %c0_i32, %c0_i32_0 : i32, i32
  }
  func.func @transform_4(%arg0: i32) -> (i32, i32) {
    %c0_i32 = arith.constant 0 : i32
    %c0_i32_0 = arith.constant 0 : i32
    %c0_i32_1 = arith.constant 0 : i32
    return %c0_i32, %c0_i32_0 : i32, i32
  }
  func.func @transform_5(%arg0: i32) -> (i32, i32) {
    %c0_i32 = arith.constant 0 : i32
    %c0_i32_0 = arith.constant 0 : i32
    %c0_i32_1 = arith.constant 0 : i32
    return %c0_i32, %c0_i32_0 : i32, i32
  }
  func.func @transform_6(%arg0: i32) -> (i32, i32) {
    %c0_i32 = arith.constant 0 : i32
    %c0_i32_0 = arith.constant 0 : i32
    %c0_i32_1 = arith.constant 0 : i32
    return %c0_i32, %c0_i32_0 : i32, i32
  }
  func.func @transform_7(%arg0: i32) -> (i32, i32) {
    %c0_i32 = arith.constant 0 : i32
    %c0_i32_0 = arith.constant 0 : i32
    return %arg0, %c0_i32 : i32, i32
  }
}

</mosaic_0001>

<bundles_post_ra>
// kernel: tpu_custom_call.1
= control target key start
LH: loop header
LB: loop body
LE: loop exit
PB: predicated region body
PF: predicated region fallthrough
CT: control target
= control target key end

     0   :  { %12 = vsyncpa [#allocation3], 0  ;;  %s821_s0 = inlined_call_operand.hbm [shape: f32[8,16], index: 0, kind: input, shape index: {}]   ;;  %s822_s1 = inlined_call_operand.hbm [shape: bf16[16,256], index: 1, kind: input, shape index: {}]   ;;  %s823_s2 = inlined_call_operand.vmem [shape: f32[1,256], index: 2, kind: input, shape index: {}]   ;;  %s824_s3 = inlined_call_operand.hbm [shape: bf16[256,128], index: 3, kind: input, shape index: {}]   ;;  %s825_s4 = inlined_call_operand.vmem [shape: f32[1,128], index: 4, kind: input, shape index: {}]   ;;  %s826_s5 = inlined_call_operand.hbm [shape: bf16[128,128], index: 5, kind: input, shape index: {}]   ;;  %s827_s6 = inlined_call_operand.vmem [shape: f32[1,128], index: 6, kind: input, shape index: {}]   ;;  %s828_s7 = inlined_call_operand.hbm [shape: bf16[8,128], index: 7, kind: output, shape index: {}]  }
   0x1   :  { %13 = vsyncpa [#allocation6], 0 }
   0x2   :  { %14 = vsyncpa [#allocation9], 0 }
   0x3   :  { %15 = vsyncpa [#allocation4], 0  ;;  %s700_s24 = smov [#allocation5]   ;;  %s582_s28 = scalar_lea.hbm %s822_s1, 256 }
   0x4   :  { %s31_s25 = sshll.u32 %s700_s24, 4  ;;  %p583_p0 = scmp.ne.s32.totalorder %s822_s1, %s582_s28  ;;  %s32_s25 = int_to_ptr.vmem [resolvable:$true] %s31_s25 }
   0x5   :  { %p586_p1 = scmp.lt.u32.totalorder %s582_s28, %s822_s1 }
   0x7   :  { %p588_p2 = pnand %p586_p1, %p583_p0 }
   0x9   :  { %591 = shalt.err (!%p588_p2)
}
   0xa   :  { %s592_s10 = scalar_lea.vmem %s32_s25, 256  ;;  %p597_p4 = scmp.lt.s32.totalorder %s32_s25, %s32_s25 }
   0xb   :  { %p593_p3 = scmp.ne.s32.totalorder %s32_s25, %s592_s10  ;;  %p598_p5 = scmp.lt.s32.totalorder %s592_s10, %s592_s10 }
   0xd   :  { %p599_p6 = por %p598_p5, %p597_p4 }
   0xf   :  { %p600_p7 = pnand %p599_p6, %p593_p3 }
  0x11   :  { %603 = shalt.err (!%p600_p7)
}
  0x12   :  { %s701_s11 = smov 128   ;;  %s702_s12 = smov 8  }
  0x13   :  { %37 = dma.hbm_to_vmem [thread:$0]  %s822_s1, 256, %s32_s25, [#allocation6], %s701_s11, %s701_s11, %s702_s12  }
  0x14   :  { %s703_s15 = smov [#allocation2]   ;;  %s704_s17 = smov [#allocation7]  }
  0x15   :  { %s22_s16 = sshll.u32 %s703_s15, 4  ;;  %s45_s18 = sshll.u32 %s704_s17, 4  ;;  %s23_s16 = int_to_ptr.vmem [resolvable:$true] %s22_s16  ;;  %s46_s18 = int_to_ptr.vmem [resolvable:$true] %s45_s18 }
  0x16   :  { %s604_s21 = scalar_lea.hbm %s821_s0, 128 }
  0x17   :  { %p605_p8 = scmp.ne.s32.totalorder %s821_s0, %s604_s21  ;;  %p608_p9 = scmp.lt.u32.totalorder %s604_s21, %s821_s0 }
  0x19   :  { %p610_p10 = pnand %p608_p9, %p605_p8 }
  0x1b   :  { %613 = shalt.err (!%p610_p10)
}
  0x1c   :  { %s614_s1 = scalar_lea.vmem %s23_s16, 128  ;;  %p619_p12 = scmp.lt.s32.totalorder %s23_s16, %s23_s16 }
  0x1d   :  { %p615_p11 = scmp.ne.s32.totalorder %s23_s16, %s614_s1  ;;  %p620_p13 = scmp.lt.s32.totalorder %s614_s1, %s614_s1 }
  0x1f   :  { %p621_p0 = por %p620_p13, %p619_p12 }
  0x21   :  { %p622_p1 = pnand %p621_p0, %p615_p11 }
  0x23   :  { %625 = shalt.err (!%p622_p1)
}
  0x24   :  { %25 = dma.hbm_to_vmem [thread:$0]  %s821_s0, 128, %s23_s16, [#allocation3]  }
  0x25   :  { %s626_s30 = scalar_lea.hbm %s824_s3, 2048 }
  0x26   :  { %p627_p2 = scmp.ne.s32.totalorder %s824_s3, %s626_s30  ;;  %p630_p3 = scmp.lt.u32.totalorder %s626_s30, %s824_s3 }
  0x28   :  { %p632_p4 = pnand %p630_p3, %p627_p2 }
  0x2a   :  { %635 = shalt.err (!%p632_p4)
}
  0x2b   :  { %s636_s12 = scalar_lea.vmem %s46_s18, 2048  ;;  %p641_p6 = scmp.lt.s32.totalorder %s46_s18, %s46_s18 }
  0x2c   :  { %p637_p5 = scmp.ne.s32.totalorder %s46_s18, %s636_s12  ;;  %p642_p7 = scmp.lt.s32.totalorder %s636_s12, %s636_s12 }
  0x2e   :  { %p643_p8 = por %p642_p7, %p641_p6 }
  0x30   :  { %p644_p9 = pnand %p643_p8, %p637_p5 }
  0x32   :  { %647 = shalt.err (!%p644_p9)
}
  0x33   :  { %s705_s0 = smov 64   ;;  %s706_s13 = smov 4  }
  0x34   :  { %51 = dma.hbm_to_vmem [thread:$0]  %s824_s3, 2048, %s46_s18, [#allocation6], %s705_s0, %s705_s0, %s706_s13  }
  0x35   :  { %s707_s16 = smov [#allocation8]   ;;  %s648_s21 = scalar_lea.hbm %s826_s5, 1024 }
  0x36   :  { %s59_s17 = sshll.u32 %s707_s16, 4  ;;  %p649_p10 = scmp.ne.s32.totalorder %s826_s5, %s648_s21  ;;  %s60_s17 = int_to_ptr.vmem [resolvable:$true] %s59_s17 }
  0x37   :  { %p652_p11 = scmp.lt.u32.totalorder %s648_s21, %s826_s5 }
  0x39   :  { %p654_p12 = pnand %p652_p11, %p649_p10 }
  0x3b   :  { %657 = shalt.err (!%p654_p12)
}
  0x3c   :  { %s658_s1 = scalar_lea.vmem %s60_s17, 1024  ;;  %p663_p0 = scmp.lt.s32.totalorder %s60_s17, %s60_s17 }
  0x3d   :  { %p659_p13 = scmp.ne.s32.totalorder %s60_s17, %s658_s1  ;;  %p664_p1 = scmp.lt.s32.totalorder %s658_s1, %s658_s1 }
  0x3f   :  { %p665_p2 = por %p664_p1, %p663_p0 }
  0x41   :  { %p666_p3 = pnand %p665_p2, %p659_p13 }
  0x43   :  { %669 = shalt.err (!%p666_p3)
}
  0x44   :  { %65 = dma.hbm_to_vmem [thread:$0]  %s826_s5, 1024, %s60_s17, [#allocation9], %s705_s0, %s705_s0, %s706_s13  }
  0x45   :  { %692 = dma.done.wait [#allocation3], 128  }
  0x46   :  { %693 = vsyncadd [#allocation3], 4294967168 }
  0x47   :  { %694 = dma.done.wait [#allocation6], 2304  }
  0x48   :  { %695 = vsyncadd [#allocation6], 4294964992 }
  0x49   :  { %696 = dma.done.wait [#allocation9], 1024  }
  0x4a   :  { %697 = vsyncadd [#allocation9], 4294966272  ;;  %v708_v0 = vmov 0   ;;  %v555_v1 = vld [vmem:[#allocation5 + $0x4] ss:$8 sps:$4 sm:$0xff]   ;;  %v81_v3 = vld [vmem:[#allocation2] sm:$0xff]  ;;  %v87_v28 = vlaneseq }
  0x4b   :  { %143 = vmatprep.mubr.bf16.mxu0 %v708_v0  ;;  %v557_v2 = vld [vmem:[#allocation5] ss:$8 sps:$4 sm:$0xff]   ;;  %111 = vmatprep.subr.bf16.mxu0 %v555_v1  ;;  %v82_v4 = vpack.c.bf16 %v81_v3, %v81_v3  ;;  %v558_v5 = vld [vmem:[#allocation7 + $0x40] sm:$0xff]   ;;  %vm107_vm0 = vcmask 130048   ;;  %v560_v7 = vld [vmem:[#allocation7 + $0x48] sm:$0xff]   ;;  %v709_v22 = vmov 0.0  }
  0x4c   :  { %112 = vmatpush1.bf16.msra.mxu0 %v557_v2  ;;  %v559_v6 = vld [vmem:[#allocation7] sm:$0xff]   ;;  %492 = vmatprep.subr.bf16.mxu1 %v558_v5  ;;  %v561_v8 = vld [vmem:[#allocation7 + $0x8] sm:$0xff]   ;;  %v562_v9 = vld [vmem:[#allocation7 + $0x50] sm:$0xff]   ;;  %v88_v29 = vshrl.u32 %v87_v28, 7  ;;  %vm710_vm1 = vmmov 0   ;;  %s711_s30 = smov [#allocation10]  }
  0x4d   :  { %493 = vmatpush3.bf16.msra.mxu1 %v559_v6  ;;  %v563_v10 = vld [vmem:[#allocation7 + $0x10] sm:$0xff]   ;;  %v564_v11 = vld [vmem:[#allocation7 + $0x58] sm:$0xff]   ;;  %v566_v13 = vld [vmem:[#allocation7 + $0x60] sm:$0xff]   ;;  %523 = vmatprep.subr.bf16.mxu0 %v709_v22  ;;  %s452_s8 = sshll.u32 %s711_s30, 4  ;;  %s453_s8 = int_to_ptr.vmem [resolvable:$true] %s452_s8 }
  0x4e   :  { %494 = vmatprep.subr.bf16.mxu1 %v560_v7  ;;  %v565_v12 = vld [vmem:[#allocation7 + $0x18] sm:$0xff]   ;;  %v567_v14 = vld [vmem:[#allocation7 + $0x20] sm:$0xff]   ;;  %v568_v15 = vld [vmem:[#allocation7 + $0x68] sm:$0xff]   ;;  %v89_v30 = vsub.s32 0, %v88_v29  ;;  %v93_v32 = vsub.s32 1, %v88_v29  ;;  %p675_p5 = scmp.lt.s32.totalorder %s453_s8, %s453_s8 }
  0x4f   :  { %465 = vmatmul.mubr.msk.bf16.vlgmr.msra.gmra.mrb[0].mxu0 %vm107_vm0, %v82_v4  ;;  %v569_v16 = vld [vmem:[#allocation7 + $0x28] sm:$0xff]   ;;  %v570_v17 = vld [vmem:[#allocation7 + $0x70] sm:$0xff]   ;;  %v572_v19 = vld [vmem:[#allocation7 + $0x78] sm:$0xff]  }
  0x50   :  { %v571_v18 = vld [vmem:[#allocation7 + $0x30] sm:$0xff]   ;;  %v573_v20 = vld [vmem:[#allocation7 + $0x38] sm:$0xff]   ;;  %v574_v21 = vld [vmem:[#allocation8] sm:$0xff]   ;;  %539 = vmatprep.mubr.msk.bf16.mxu0 %vm710_vm1, %v709_v22 }
  0x51   :  { %495 = vmatpush3.bf16.msra.mxu1 %v561_v8  ;;  %524 = vmatpush3.bf16.msra.mxu0 %v574_v21  ;;  %v575_v23 = vld [vmem:[#allocation8 + $0x8] sm:$0xff]   ;;  %v576_v24 = vld [vmem:[#allocation8 + $0x10] sm:$0xff]   ;;  %v577_v25 = vld [vmem:[#allocation8 + $0x18] sm:$0xff]  }
  0x52   :  { %496 = vmatprep.subr.bf16.mxu1 %v562_v9  ;;  %525 = vmatprep.subr.bf16.mxu0 %v709_v22  ;;  %v578_v26 = vld [vmem:[#allocation8 + $0x20] sm:$0xff]   ;;  %v579_v27 = vld [vmem:[#allocation8 + $0x28] sm:$0xff]   ;;  %v580_v45 = vld [vmem:[#allocation8 + $0x30] sm:$0xff]  }
  0x53   :  { %v85_v31 = vld [vmem:[%s823_s2] sm:$0x3]  ;;  %v581_v46 = vld [vmem:[#allocation8 + $0x38] sm:$0xff]  }
  0x54   :  { %v90_v33 = vrot.slane %v85_v31, %v89_v30  ;;  %v94_v34 = vrot.slane %v85_v31, %v93_v32  ;;  %v466_v48 = vld [vmem:[%s825_s4] ss:$0 sm:$0xff]  ;;  %s670_s4 = scalar_lea.vmem %s453_s8, 64 }
  0x55   :  { %497 = vmatpush3.bf16.msra.mxu1 %v563_v10  ;;  %526 = vmatpush3.bf16.msra.mxu0 %v575_v23  ;;  %v483_v56 = vld [vmem:[%s827_s6] ss:$0 sm:$0xff]  ;;  %p671_p4 = scmp.ne.s32.totalorder %s453_s8, %s670_s4  ;;  %p676_p6 = scmp.lt.s32.totalorder %s670_s4, %s670_s4 }
  0x56   :  { %498 = vmatprep.subr.bf16.mxu1 %v564_v11  ;;  %527 = vmatprep.subr.bf16.mxu0 %v709_v22 }
  0x57   :  { %p677_p7 = por %p676_p6, %p675_p5 }
  0x59   :  { %499 = vmatpush3.bf16.msra.mxu1 %v565_v12  ;;  %528 = vmatpush3.bf16.msra.mxu0 %v576_v24  ;;  %p678_p8 = pnand %p677_p7, %p671_p4 }
  0x5a   :  { %500 = vmatprep.subr.bf16.mxu1 %v566_v13  ;;  %529 = vmatprep.subr.bf16.mxu0 %v709_v22 }
  0x5d   :  { %501 = vmatpush3.bf16.msra.mxu1 %v567_v14  ;;  %530 = vmatpush3.bf16.msra.mxu0 %v577_v25 }
  0x5e   :  { %502 = vmatprep.subr.bf16.mxu1 %v568_v15  ;;  %531 = vmatprep.subr.bf16.mxu0 %v709_v22 }
  0x61   :  { %503 = vmatpush3.bf16.msra.mxu1 %v569_v16  ;;  %532 = vmatpush3.bf16.msra.mxu0 %v578_v26 }
  0x62   :  { %504 = vmatprep.subr.bf16.mxu1 %v570_v17  ;;  %533 = vmatprep.subr.bf16.mxu0 %v709_v22 }
  0x65   :  { %505 = vmatpush3.bf16.msra.mxu1 %v571_v18  ;;  %534 = vmatpush3.bf16.msra.mxu0 %v579_v27 }
  0x66   :  { %506 = vmatprep.subr.bf16.mxu1 %v572_v19  ;;  %535 = vmatprep.subr.bf16.mxu0 %v709_v22 }
  0x69   :  { %507 = vmatpush3.bf16.msra.mxu1 %v573_v20  ;;  %536 = vmatpush3.bf16.msra.mxu0 %v580_v45 }
  0x6a   :  { %537 = vmatprep.subr.bf16.mxu0 %v709_v22 }
  0x6d   :  { %538 = vmatpush3.bf16.msra.mxu0 %v581_v46 }
 0x122   :  { %v145_v35 = vpop.f32.mrb[0].mxu0 }
 0x123   :  { %v146_v36 = vadd.f32 %v145_v35, %v90_v33  ;;  %v147_v37 = vpop.f32.mrb[1].mxu0 }
 0x124   :  { %v148_v38 = vadd.f32 %v147_v37, %v94_v34  ;;  %v149_v39 = vpop.f32.mrb[2].mxu0 }
 0x125   :  { %v152_v40 = vmax.f32 %v146_v36, 0.0  ;;  %v150_v41 = vpop.f32.mrb[3].mxu0 }
 0x126   :  { %v153_v42 = vmax.f32 %v148_v38, 0.0 }
 0x127   :  { %v154_v44 = vpack.c.bf16 %v152_v40, %v152_v40 }
 0x128   :  { %v155_v43 = vpack.c.bf16 %v153_v42, %v153_v42 }
 0x12a   :  { %323 = vmatprep.mubr.bf16.mxu1 %v155_v43 }
 0x12b   :  { %324 = vmatmul.mubr.bf16.vlgmr.msra.gmra.mrb[0].mxu1 %v154_v44 }
 0x1fe   :  { %v508_v47 = vpop.f32.mrb[0].mxu1 }
 0x1ff   :  { %v509_v49 = vpop.f32.mrb[1].mxu1 }
 0x200   :  { %v510_v50 = vadd.f32 %v509_v49, %v508_v47  ;;  %v511_v51 = vpop.f32.mrb[2].mxu1 }
 0x201   :  { %v512_v52 = vpop.f32.mrb[3].mxu1 }
 0x202   :  { %v326_v53 = vadd.f32 %v510_v50, %v466_v48 }
 0x204   :  { %v331_v54 = vmax.f32 %v326_v53, 0.0 }
 0x206   :  { %v332_v55 = vpack.c.bf16 %v331_v54, %v331_v54 }
 0x208   :  { %540 = vmatmul.mubr.bf16.vlgmr.msra.gmra.mrb[4].mxu0 %v332_v55 }
 0x2db   :  { %v438_v57 = vpop.f32.mrb[4].mxu0 }
 0x2dc   :  { %v439_v58 = vadd.f32 %v483_v56, %v438_v57  ;;  %v541_v59 = vpop.f32.mrb[5].mxu0 }
 0x2dd   :  { %v441_v60 = vpop.f32.mrb[6].mxu0 }
 0x2de   :  { %v444_v61 = vpack.c.bf16 %v439_v58, %v439_v58  ;;  %v542_v62 = vpop.f32.mrb[7].mxu0 }
 0x2e0   :  { %445 = vst [vmem:[#allocation10] sm:$0xf] %v444_v61 }
 0x2e1   :  { %681 = shalt.err (!%p678_p8)
}
 0x2e2   :  { %s682_s6 = scalar_lea.hbm %s828_s7, 64 }
 0x2e3   :  { %p683_p9 = scmp.ne.s32.totalorder %s828_s7, %s682_s6  ;;  %p686_p10 = scmp.lt.u32.totalorder %s682_s6, %s828_s7 }
 0x2e5   :  { %p688_p11 = pnand %p686_p10, %p683_p9 }
 0x2e7   :  { %691 = shalt.err (!%p688_p11)
}
 0x2e8   :  { %455 = dma.vmem_to_hbm [thread:$0]  %s453_s8, 64, %s828_s7, [#allocation4]  }
 0x2e9   :  { %698 = dma.done.wait [#allocation4], 64  }
 0x2ea   :  { %699 = vsyncadd [#allocation4], 4294967232 }
 0x2eb   :  { %459 = vsyncpa [#allocation3], 1 }
 0x2ec   :  { %460 = vsyncpa [#allocation6], 1 }
 0x2ed   :  { %461 = vsyncpa [#allocation9], 1 }
 0x2ee   :  { %462 = vsyncpa [#allocation4], 1 }

</bundles_post_ra>
